<compile_context>
chip_gen: v6e
topology: v6e:2x2x1
jax: 0.10.0
libtpu: 0.0.40
codegen_flags: <defaults>
</compile_context>

<pallas_src>
import functools

import jax
import jax.numpy as jnp
from jax import lax
from jax.experimental import pallas as pl
from jax.experimental.pallas import tpu as pltpu


# ----------------------------------------------------------------------------
# Stage 1: input projection for all timesteps (no serial dependence).
# ----------------------------------------------------------------------------
def input_proj_kernel(x_ref, wx_ref, b_ref, z_ref):
    # (T*B, dimIn) @ (dimIn, 4H) on the MXU in bf16, accumulate in f32,
    # bias folded in here so the recurrent kernel never touches Wx or b.
    z_ref[...] = (
        jnp.dot(x_ref[...], wx_ref[...], preferred_element_type=jnp.float32)
        + b_ref[...]
    )


# ----------------------------------------------------------------------------
# Stage 2: the sequential recurrence, t_block timesteps per grid step.
# ----------------------------------------------------------------------------
def lstm_recurrent_kernel(z_ref, wh_hbm_ref, out_ref,
                          wh_vmem, wh_sem, h_scr, c_scr, *, dimH, t_block):
    i = pl.program_id(0)

    @pl.when(i == 0)
    def _():
        # Copy the recurrent weight HBM -> VMEM exactly once; the scratch
        # persists across all grid steps (single-buffered, no per-step DMA).
        cp = pltpu.make_async_copy(wh_hbm_ref, wh_vmem, wh_sem)
        cp.start()
        cp.wait()
        # h, c start at zeros (same as the PyTorch forward with h=None).
        h_scr[...] = jnp.zeros_like(h_scr)
        c_scr[...] = jnp.zeros_like(c_scr)

    def step(s, carry):
        h, c = carry
        # Only the recurrent part runs per step; x @ Wx + b is already in z_ref.
        z = z_ref[s] + jnp.dot(h.astype(jnp.bfloat16), wh_vmem[...],
                               preferred_element_type=jnp.float32)
        # dimH % 128 == 0 -> these slices are lane-aligned (free vreg views).
        ft = jax.nn.sigmoid(z[:, 0 * dimH:1 * dimH])
        it = jax.nn.sigmoid(z[:, 1 * dimH:2 * dimH])
        gt = jnp.tanh(z[:, 2 * dimH:3 * dimH])
        ot = jax.nn.sigmoid(z[:, 3 * dimH:4 * dimH])
        c_new = ft * c + it * gt
        h_new = ot * jnp.tanh(c_new)
        out_ref[s] = h_new.astype(out_ref.dtype)   # fills the VMEM output slab
        return h_new, c_new

    h_fin, c_fin = lax.fori_loop(0, t_block, step,
                                 (h_scr[...], c_scr[...]), unroll=True)
    h_scr[...] = h_fin
    c_scr[...] = c_fin


# ----------------------------------------------------------------------------
# Wrapper
# ----------------------------------------------------------------------------
def lstm_forward(x, wx, wh, b, *, t_block=8):
    T, B, dimIn = x.shape
    dimH = wh.shape[0]
    assert T % t_block == 0, "pad T to a multiple of t_block"
    assert dimH % 128 == 0, "keep gate boundaries lane-aligned (dimH % 128 == 0)"
    assert B % 8 == 0, "batch must be a multiple of 8 sublanes"

    # bf16 matmul operands, f32 everywhere else.
    x_bf = x.astype(jnp.bfloat16)
    wx_bf = wx.astype(jnp.bfloat16)
    wh_bf = wh.astype(jnp.bfloat16)

    # ---- Stage 1: one big GEMM over all timesteps. ----
    z2d = pl.pallas_call(
        input_proj_kernel,
        out_shape=jax.ShapeDtypeStruct((T * B, 4 * dimH), jnp.float32),
        grid_spec=pltpu.PrefetchScalarGridSpec(
            num_scalar_prefetch=0,
            grid=(1,),
            in_specs=[
                pl.BlockSpec((T * B, dimIn), lambda i: (0, 0)),
                pl.BlockSpec((dimIn, 4 * dimH), lambda i: (0, 0)),
                pl.BlockSpec((1, 4 * dimH), lambda i: (0, 0)),
            ],
            out_specs=pl.BlockSpec((T * B, 4 * dimH), lambda i: (0, 0)),
        ),
        compiler_params=pltpu.CompilerParams(
            dimension_semantics=("parallel",)),
    )(x_bf.reshape(T * B, dimIn), wx_bf, b)
    z = z2d.reshape(T, B, 4 * dimH)

    # ---- Stage 2: sequential recurrence over time blocks. ----
    kernel = functools.partial(lstm_recurrent_kernel, dimH=dimH, t_block=t_block)
    return pl.pallas_call(
        kernel,
        out_shape=jax.ShapeDtypeStruct((T, B, dimH), jnp.float32),
        grid_spec=pltpu.PrefetchScalarGridSpec(
            num_scalar_prefetch=0,
            grid=(T // t_block,),
            in_specs=[
                pl.BlockSpec((t_block, B, 4 * dimH), lambda i: (i, 0, 0)),
                pl.BlockSpec(memory_space=pl.ANY),   # Wh: raw HBM ref, copied once
            ],
            out_specs=pl.BlockSpec((t_block, B, dimH), lambda i: (i, 0, 0)),
            scratch_shapes=[
                pltpu.VMEM((dimH, 4 * dimH), jnp.bfloat16),  # resident Wh
                pltpu.SemaphoreType.DMA,                     # its copy semaphore
                pltpu.VMEM((B, dimH), jnp.float32),          # h carry
                pltpu.VMEM((B, dimH), jnp.float32),          # c carry
            ],
        ),
        compiler_params=pltpu.CompilerParams(
            dimension_semantics=("arbitrary",)),  # serial recurrence
    )(z, wh_bf)


def init_params(key, dimH, dimIn, dimOut):
    """Deterministic init mimicking nn.Linear defaults (U(-1/sqrt(fan_in), .))."""
    fan_in = dimIn + dimH
    bound = 1.0 / jnp.sqrt(jnp.float32(fan_in))
    keys = jax.random.split(key, 10)
    # Gate order: F, I, C, O. PyTorch weight shape: (dimH, dimIn + dimH).
    Ws = [jax.random.uniform(keys[i], (dimH, fan_in), jnp.float32, -bound, bound)
          for i in range(4)]
    bs = [jax.random.uniform(keys[4 + i], (dimH,), jnp.float32, -bound, bound)
          for i in range(4)]
    # Split into x / h parts and transpose: cat(x, h) @ W.T == x @ Wx + h @ Wh.
    wx = jnp.concatenate([W[:, :dimIn].T for W in Ws], axis=1)   # (dimIn, 4H)
    wh = jnp.concatenate([W[:, dimIn:].T for W in Ws], axis=1)   # (dimH, 4H)
    b = jnp.concatenate(bs, axis=0)[None, :]                     # (1, 4H)
    # TODO(synk): linearDecode (dimH -> dimOut) is not called in forward(); omitted.
    return wx, wh, b


def lstm_reference(x, wx, wh, b):
    """Pure-JAX reference with the same bf16-matmul / f32-state math."""
    T, B, dimIn = x.shape
    dimH = wh.shape[0]
    x_bf = x.astype(jnp.bfloat16)
    wx_bf = wx.astype(jnp.bfloat16)
    wh_bf = wh.astype(jnp.bfloat16)
    zin = jnp.dot(x_bf.reshape(T * B, dimIn), wx_bf,
                  preferred_element_type=jnp.float32).reshape(T, B, 4 * dimH) + b
    h = jnp.zeros((B, dimH), jnp.float32)
    c = jnp.zeros((B, dimH), jnp.float32)
    outs = []
    for t in range(T):
        z = zin[t] + jnp.dot(h.astype(jnp.bfloat16), wh_bf,
                             preferred_element_type=jnp.float32)
        ft = jax.nn.sigmoid(z[:, 0 * dimH:1 * dimH])
        it = jax.nn.sigmoid(z[:, 1 * dimH:2 * dimH])
        gt = jnp.tanh(z[:, 2 * dimH:3 * dimH])
        ot = jax.nn.sigmoid(z[:, 3 * dimH:4 * dimH])
        c = ft * c + it * gt
        h = ot * jnp.tanh(c)
        outs.append(h)
    return jnp.stack(outs, axis=0)


if __name__ == "__main__":
    # Small but lane-aligned shapes: dimH multiple of 128 keeps gate slices and
    # the output store lane-dense; B = 8 is exactly one sublane tile.
    T, B, dimIn, dimH, dimOut = 32, 8, 32, 128, 24

    key = jax.random.PRNGKey(0)
    k_x, k_p = jax.random.split(key)
    x = jax.random.normal(k_x, (T, B, dimIn), jnp.float32)
    wx, wh, b = init_params(k_p, dimH, dimIn, dimOut)

    out = lstm_forward(x, wx, wh, b, t_block=8)
    out = jax.block_until_ready(out)

    ref = lstm_reference(x, wx, wh, b)
    assert out.shape == (T, B, dimH)
    assert jnp.allclose(out, ref, atol=2e-3, rtol=2e-3), "mismatch vs reference"

    print("KERNEL_OK")
</pallas_src>

<mosaic_0001>
module attributes {stable_mosaic.version = 11 : i64} {
  func.func @input_proj_kernel(%arg0: i32, %arg1: memref<256x32xbf16, #tpu.memory_space<vmem>>, %arg2: memref<32x512xbf16, #tpu.memory_space<vmem>>, %arg3: memref<1x512xf32, #tpu.memory_space<vmem>>, %arg4: memref<256x512xf32, #tpu.memory_space<vmem>>) attributes {dimension_semantics = [#tpu.dimension_semantics<parallel>], iteration_bounds = array<i64: 1>, scalar_prefetch = 0 : i64, scratch_operands = 0 : i64, tpu.core_type = #tpu.core_type<tc>, window_params = [{pipeline_mode = #tpu.pipeline_mode<synchronous>, transform_indices = @transform_0, window_bounds = array<i64: 256, 32>}, {pipeline_mode = #tpu.pipeline_mode<synchronous>, transform_indices = @transform_1, window_bounds = array<i64: 32, 512>}, {pipeline_mode = #tpu.pipeline_mode<synchronous>, transform_indices = @transform_2, window_bounds = array<i64: 1, 512>}, {pipeline_mode = #tpu.pipeline_mode<synchronous>, transform_indices = @transform_3, window_bounds = array<i64: 256, 512>}]} {
    %c0 = arith.constant 0 : index
    %c0_0 = arith.constant 0 : index
    %0 = vector.load %arg1[%c0, %c0_0] : memref<256x32xbf16, #tpu.memory_space<vmem>>, vector<256x32xbf16>
    %c0_1 = arith.constant 0 : index
    %c0_2 = arith.constant 0 : index
    %1 = vector.load %arg2[%c0_1, %c0_2] : memref<32x512xbf16, #tpu.memory_space<vmem>>, vector<32x512xbf16>
    %cst = arith.constant dense<0.000000e+00> : vector<256x512xf32>
    %2 = tpu.matmul %0, %1, %cst {dimension_numbers = #tpu.dot_dimension_numbers<[1], [0], [0], [1], [0, 0, 1, 1], [], []>} : vector<256x32xbf16>, vector<32x512xbf16>, vector<256x512xf32> -> vector<256x512xf32>
    %c0_3 = arith.constant 0 : index
    %c0_4 = arith.constant 0 : index
    %3 = vector.load %arg3[%c0_3, %c0_4] : memref<1x512xf32, #tpu.memory_space<vmem>>, vector<1x512xf32>
    %4 = vector.broadcast %3 : vector<1x512xf32> to vector<256x512xf32>
    %5 = arith.addf %2, %4 : vector<256x512xf32>
    %c0_5 = arith.constant 0 : index
    %c0_6 = arith.constant 0 : index
    %6 = vector.load %arg4[%c0_5, %c0_6] : memref<256x512xf32, #tpu.memory_space<vmem>>, vector<256x512xf32>
    tpu.vector_store %arg4[%c0_5, %c0_6], %5 {strides = array<i32>} : memref<256x512xf32, #tpu.memory_space<vmem>>, vector<256x512xf32>,
    return
  }
  func.func @transform_0(%arg0: i32) -> (i32, i32) {
    %c0_i32 = arith.constant 0 : i32
    %c0_i32_0 = arith.constant 0 : i32
    %c0_i32_1 = arith.constant 0 : i32
    return %c0_i32, %c0_i32_0 : i32, i32
  }
  func.func @transform_1(%arg0: i32) -> (i32, i32) {
    %c0_i32 = arith.constant 0 : i32
    %c0_i32_0 = arith.constant 0 : i32
    %c0_i32_1 = arith.constant 0 : i32
    return %c0_i32, %c0_i32_0 : i32, i32
  }
  func.func @transform_2(%arg0: i32) -> (i32, i32) {
    %c0_i32 = arith.constant 0 : i32
    %c0_i32_0 = arith.constant 0 : i32
    %c0_i32_1 = arith.constant 0 : i32
    return %c0_i32, %c0_i32_0 : i32, i32
  }
  func.func @transform_3(%arg0: i32) -> (i32, i32) {
    %c0_i32 = arith.constant 0 : i32
    %c0_i32_0 = arith.constant 0 : i32
    %c0_i32_1 = arith.constant 0 : i32
    return %c0_i32, %c0_i32_0 : i32, i32
  }
}

</mosaic_0001>

<bundles_post_ra>
// kernel: tpu_custom_call.1
= control target key start
LH: loop header
LB: loop body
LE: loop exit
PB: predicated region body
PF: predicated region fallthrough
CT: control target
= control target key end

     0   :  { %v887_v2 = vmov 0   ;;  %vm198_vm0 = vcmask 261120   ;;  %s1189_s0 = inlined_call_operand.vmem [shape: bf16[256,32], index: 0, kind: input, shape index: {}]   ;;  %s1190_s1 = inlined_call_operand.vmem [shape: bf16[32,512], index: 1, kind: input, shape index: {}]   ;;  %s1191_s2 = inlined_call_operand.vmem [shape: f32[1,512], index: 2, kind: input, shape index: {}]   ;;  %s1192_s3 = inlined_call_operand.hbm [shape: f32[256,512], index: 3, kind: output, shape index: {}]  }
   0x1   :  { %v837_v0 = vld [vmem:[%s1190_s1 + $0x24] ss:$16 sps:$4 sm:$0xff]   ;;  %v839_v1 = vld [vmem:[%s1190_s1 + $0x2c] ss:$16 sps:$4 sm:$0xff]   ;;  %279 = vmatprep.mubr.bf16.mxu0 %v887_v2  ;;  %472 = vmatprep.mubr.bf16.mxu1 %v887_v2  ;;  %v841_v3 = vld [vmem:[%s1190_s1 + $0x20] ss:$16 sps:$4 sm:$0xff]  }
   0x2   :  { %259 = vmatprep.subr.bf16.mxu0 %v837_v0  ;;  %v842_v4 = vld [vmem:[%s1190_s1 + $0x28] ss:$16 sps:$4 sm:$0xff]   ;;  %452 = vmatprep.subr.bf16.mxu1 %v839_v1  ;;  %v843_v5 = vld [vmem:[%s1190_s1 + $0x4] ss:$16 sps:$4 sm:$0xff]   ;;  %v845_v6 = vld [vmem:[%s1190_s1 + $0xc] ss:$16 sps:$4 sm:$0xff]  }
   0x3   :  { %260 = vmatpush1.bf16.msra.mxu0 %v841_v3  ;;  %453 = vmatpush1.bf16.msra.mxu1 %v842_v4  ;;  %v847_v7 = vld [vmem:[%s1190_s1] ss:$16 sps:$4 sm:$0xff]   ;;  %v848_v8 = vld [vmem:[%s1190_s1 + $0x8] ss:$16 sps:$4 sm:$0xff]  }
   0x4   :  { %261 = vmatprep.subr.bf16.mxu0 %v843_v5  ;;  %454 = vmatprep.subr.bf16.mxu1 %v845_v6  ;;  %v849_v9 = vld [vmem:[%s1189_s0] sm:$0xff]   ;;  %v850_v10 = vld [vmem:[%s1189_s0 + $0x8] sm:$0xff]  }
   0x7   :  { %262 = vmatpush1.bf16.msra.mxu0 %v847_v7  ;;  %455 = vmatpush1.bf16.msra.mxu1 %v848_v8 }
   0xa   :  { %801 = vmatmul.mubr.msk.bf16.vlgmr.msra.gmra.mxu0 %vm198_vm0, %v849_v9  ;;  %817 = vmatmul.mubr.msk.bf16.vlgmr.msra.gmra.mxu1 %vm198_vm0, %v849_v9 }
   0xb   :  { %289 = vmatprep.mubr.bf16.mxu0 %v887_v2  ;;  %482 = vmatprep.mubr.bf16.mxu1 %v887_v2 }
  0x12   :  { %802 = vmatmul.mubr.msk.bf16.gmra.mxu0 %vm198_vm0, %v850_v10  ;;  %818 = vmatmul.mubr.msk.bf16.gmra.mxu1 %vm198_vm0, %v850_v10 }
  0x13   :  { %299 = vmatprep.mubr.bf16.mxu0 %v887_v2  ;;  %492 = vmatprep.mubr.bf16.mxu1 %v887_v2 }
  0x14   :  { %8 = vsyncpa [#allocation3], 0  ;;  %v851_v11 = vld [vmem:[%s1189_s0 + $0x10] sm:$0xff]   ;;  %v852_v12 = vld [vmem:[%s1189_s0 + $0x18] sm:$0xff]   ;;  %v58_v25 = vlaneseq }
  0x15   :  { %v853_v13 = vld [vmem:[%s1189_s0 + $0x20] sm:$0xff]   ;;  %v854_v14 = vld [vmem:[%s1189_s0 + $0x28] sm:$0xff]   ;;  %v855_v15 = vld [vmem:[%s1189_s0 + $0x30] sm:$0xff]  }
  0x16   :  { %v856_v16 = vld [vmem:[%s1189_s0 + $0x38] sm:$0xff]   ;;  %v857_v17 = vld [vmem:[%s1189_s0 + $0x40] sm:$0xff]   ;;  %v858_v18 = vld [vmem:[%s1189_s0 + $0x48] sm:$0xff]   ;;  %v59_v26 = vshrl.u32 %v58_v25, 7 }
  0x17   :  { %v859_v19 = vld [vmem:[%s1189_s0 + $0x50] sm:$0xff]   ;;  %v860_v20 = vld [vmem:[%s1189_s0 + $0x58] sm:$0xff]   ;;  %v861_v21 = vld [vmem:[%s1189_s0 + $0x60] sm:$0xff]  }
  0x18   :  { %v862_v22 = vld [vmem:[%s1189_s0 + $0x68] sm:$0xff]   ;;  %v863_v23 = vld [vmem:[%s1189_s0 + $0x70] sm:$0xff]   ;;  %v864_v24 = vld [vmem:[%s1189_s0 + $0x78] sm:$0xff]   ;;  %v60_v27 = vsub.s32 0, %v59_v26  ;;  %v68_v28 = vsub.s32 2, %v59_v26  ;;  %v64_v30 = vsub.s32 1, %v59_v26 }
  0x19   :  { %v56_v29 = vld [vmem:[%s1191_s2] sm:$0xf]  ;;  %v72_v31 = vsub.s32 3, %v59_v26  ;;  %s888_s0 = smov [#allocation2]  }
  0x1a   :  { %803 = vmatmul.mubr.msk.bf16.gmra.mxu0 %vm198_vm0, %v851_v11  ;;  %819 = vmatmul.mubr.msk.bf16.gmra.mxu1 %vm198_vm0, %v851_v11  ;;  %v1050_v32 = vrot.slane %v56_v29, %v60_v27  ;;  %v1052_v33 = vrot.slane %v56_v29, %v68_v28  ;;  %v1054_v34 = vrot.slane %v56_v29, %v64_v30  ;;  %s766_s2 = sshll.u32 %s888_s0, 4  ;;  %s767_s2 = int_to_ptr.vmem [resolvable:$true] %s766_s2 }
  0x1b   :  { %309 = vmatprep.mubr.bf16.mxu0 %v887_v2  ;;  %502 = vmatprep.mubr.bf16.mxu1 %v887_v2  ;;  %v1056_v35 = vrot.slane %v56_v29, %v72_v31  ;;  %s865_s6 = scalar_lea.vmem %s767_s2, 16384  ;;  %p870_p1 = scmp.lt.s32.totalorder %s767_s2, %s767_s2 }
  0x1c   :  { %p866_p0 = scmp.ne.s32.totalorder %s767_s2, %s865_s6  ;;  %p871_p2 = scmp.lt.s32.totalorder %s865_s6, %s865_s6 }
  0x1e   :  { %p872_p3 = por %p871_p2, %p870_p1 }
  0x20   :  { %p873_p4 = pnand %p872_p3, %p866_p0 }
  0x22   :  { %804 = vmatmul.mubr.msk.bf16.gmra.mxu0 %vm198_vm0, %v852_v12  ;;  %820 = vmatmul.mubr.msk.bf16.gmra.mxu1 %vm198_vm0, %v852_v12 }
  0x23   :  { %319 = vmatprep.mubr.bf16.mxu0 %v887_v2  ;;  %512 = vmatprep.mubr.bf16.mxu1 %v887_v2 }
  0x2a   :  { %805 = vmatmul.mubr.msk.bf16.gmra.mxu0 %vm198_vm0, %v853_v13  ;;  %821 = vmatmul.mubr.msk.bf16.gmra.mxu1 %vm198_vm0, %v853_v13 }
  0x2b   :  { %329 = vmatprep.mubr.bf16.mxu0 %v887_v2  ;;  %522 = vmatprep.mubr.bf16.mxu1 %v887_v2 }
  0x32   :  { %806 = vmatmul.mubr.msk.bf16.gmra.mxu0 %vm198_vm0, %v854_v14  ;;  %822 = vmatmul.mubr.msk.bf16.gmra.mxu1 %vm198_vm0, %v854_v14 }
  0x33   :  { %339 = vmatprep.mubr.bf16.mxu0 %v887_v2  ;;  %532 = vmatprep.mubr.bf16.mxu1 %v887_v2 }
  0x3a   :  { %807 = vmatmul.mubr.msk.bf16.gmra.mxu0 %vm198_vm0, %v855_v15  ;;  %823 = vmatmul.mubr.msk.bf16.gmra.mxu1 %vm198_vm0, %v855_v15 }
  0x3b   :  { %349 = vmatprep.mubr.bf16.mxu0 %v887_v2  ;;  %542 = vmatprep.mubr.bf16.mxu1 %v887_v2 }
  0x42   :  { %808 = vmatmul.mubr.msk.bf16.gmra.mxu0 %vm198_vm0, %v856_v16  ;;  %824 = vmatmul.mubr.msk.bf16.gmra.mxu1 %vm198_vm0, %v856_v16 }
  0x43   :  { %359 = vmatprep.mubr.bf16.mxu0 %v887_v2  ;;  %552 = vmatprep.mubr.bf16.mxu1 %v887_v2 }
  0x4a   :  { %809 = vmatmul.mubr.msk.bf16.gmra.mxu0 %vm198_vm0, %v857_v17  ;;  %825 = vmatmul.mubr.msk.bf16.gmra.mxu1 %vm198_vm0, %v857_v17 }
  0x4b   :  { %369 = vmatprep.mubr.bf16.mxu0 %v887_v2  ;;  %562 = vmatprep.mubr.bf16.mxu1 %v887_v2 }
  0x52   :  { %810 = vmatmul.mubr.msk.bf16.gmra.mxu0 %vm198_vm0, %v858_v18  ;;  %826 = vmatmul.mubr.msk.bf16.gmra.mxu1 %vm198_vm0, %v858_v18 }
  0x53   :  { %379 = vmatprep.mubr.bf16.mxu0 %v887_v2  ;;  %572 = vmatprep.mubr.bf16.mxu1 %v887_v2 }
  0x5a   :  { %811 = vmatmul.mubr.msk.bf16.gmra.mxu0 %vm198_vm0, %v859_v19  ;;  %827 = vmatmul.mubr.msk.bf16.gmra.mxu1 %vm198_vm0, %v859_v19 }
  0x5b   :  { %389 = vmatprep.mubr.bf16.mxu0 %v887_v2  ;;  %582 = vmatprep.mubr.bf16.mxu1 %v887_v2 }
  0x62   :  { %812 = vmatmul.mubr.msk.bf16.gmra.mxu0 %vm198_vm0, %v860_v20  ;;  %828 = vmatmul.mubr.msk.bf16.gmra.mxu1 %vm198_vm0, %v860_v20 }
  0x63   :  { %399 = vmatprep.mubr.bf16.mxu0 %v887_v2  ;;  %592 = vmatprep.mubr.bf16.mxu1 %v887_v2 }
  0x6a   :  { %813 = vmatmul.mubr.msk.bf16.gmra.mxu0 %vm198_vm0, %v861_v21  ;;  %829 = vmatmul.mubr.msk.bf16.gmra.mxu1 %vm198_vm0, %v861_v21 }
  0x6b   :  { %409 = vmatprep.mubr.bf16.mxu0 %v887_v2  ;;  %602 = vmatprep.mubr.bf16.mxu1 %v887_v2 }
  0x72   :  { %814 = vmatmul.mubr.msk.bf16.gmra.mxu0 %vm198_vm0, %v862_v22  ;;  %830 = vmatmul.mubr.msk.bf16.gmra.mxu1 %vm198_vm0, %v862_v22 }
  0x73   :  { %419 = vmatprep.mubr.bf16.mxu0 %v887_v2  ;;  %612 = vmatprep.mubr.bf16.mxu1 %v887_v2 }
  0x7a   :  { %815 = vmatmul.mubr.msk.bf16.gmra.mxu0 %vm198_vm0, %v863_v23  ;;  %831 = vmatmul.mubr.msk.bf16.gmra.mxu1 %vm198_vm0, %v863_v23 }
  0x7b   :  { %429 = vmatprep.mubr.bf16.mxu0 %v887_v2  ;;  %622 = vmatprep.mubr.bf16.mxu1 %v887_v2 }
  0x82   :  { %816 = vmatmul.mubr.msk.bf16.gmra.mxu0 %vm198_vm0, %v864_v24  ;;  %832 = vmatmul.mubr.msk.bf16.gmra.mxu1 %vm198_vm0, %v864_v24 }
  0xca   :  { %v281_v36 = vpop.f32.mrf.mxu0  ;;  %v474_v37 = vpop.f32.mrf.mxu1 }
  0xcb   :  { %v282_v38 = vadd.f32 %v281_v36, %v1050_v32  ;;  %v475_v39 = vadd.f32 %v474_v37, %v1052_v33 }
  0xcc   :  { %v283_v40 = vpop.f32.mrf.mxu0  ;;  %v476_v41 = vpop.f32.mrf.mxu1 }
  0xcd   :  { %633 = vst [vmem:[#allocation2] sm:$0xff] %v282_v38  ;;  %635 = vst [vmem:[#allocation2 + $0x10] sm:$0xff] %v475_v39  ;;  %v284_v42 = vadd.f32 %v283_v40, %v1054_v34  ;;  %v477_v43 = vadd.f32 %v476_v41, %v1056_v35 }
  0xce   :  { %v285_v44 = vpop.f32.mrf.mxu0  ;;  %v478_v45 = vpop.f32.mrf.mxu1 }
  0xcf   :  { %634 = vst [vmem:[#allocation2 + $0x8] sm:$0xff] %v284_v42  ;;  %636 = vst [vmem:[#allocation2 + $0x18] sm:$0xff] %v477_v43  ;;  %v286_v46 = vadd.f32 %v285_v44, %v1050_v32  ;;  %v479_v47 = vadd.f32 %v478_v45, %v1052_v33 }
  0xd0   :  { %v287_v48 = vpop.f32.mrf.mxu0  ;;  %v480_v49 = vpop.f32.mrf.mxu1 }
  0xd1   :  { %637 = vst [vmem:[#allocation2 + $0x20] sm:$0xff] %v286_v46  ;;  %639 = vst [vmem:[#allocation2 + $0x30] sm:$0xff] %v479_v47  ;;  %v288_v50 = vadd.f32 %v287_v48, %v1054_v34  ;;  %v481_v51 = vadd.f32 %v480_v49, %v1056_v35 }
  0xd2   :  { %v291_v52 = vpop.f32.mrf.mxu0  ;;  %v484_v53 = vpop.f32.mrf.mxu1 }
  0xd3   :  { %638 = vst [vmem:[#allocation2 + $0x28] sm:$0xff] %v288_v50  ;;  %640 = vst [vmem:[#allocation2 + $0x38] sm:$0xff] %v481_v51  ;;  %v292_v54 = vadd.f32 %v291_v52, %v1050_v32  ;;  %v485_v55 = vadd.f32 %v484_v53, %v1052_v33 }
  0xd4   :  { %v293_v56 = vpop.f32.mrf.mxu0  ;;  %v486_v57 = vpop.f32.mrf.mxu1 }
  0xd5   :  { %641 = vst [vmem:[#allocation2 + $0x40] sm:$0xff] %v292_v54  ;;  %643 = vst [vmem:[#allocation2 + $0x50] sm:$0xff] %v485_v55  ;;  %v294_v58 = vadd.f32 %v293_v56, %v1054_v34  ;;  %v487_v59 = vadd.f32 %v486_v57, %v1056_v35 }
  0xd6   :  { %v295_v60 = vpop.f32.mrf.mxu0  ;;  %v488_v61 = vpop.f32.mrf.mxu1 }
  0xd7   :  { %642 = vst [vmem:[#allocation2 + $0x48] sm:$0xff] %v294_v58  ;;  %644 = vst [vmem:[#allocation2 + $0x58] sm:$0xff] %v487_v59  ;;  %v296_v62 = vadd.f32 %v295_v60, %v1050_v32  ;;  %v489_v63 = vadd.f32 %v488_v61, %v1052_v33 }
  0xd8   :  { %v297_v0 = vpop.f32.mrf.mxu0  ;;  %v490_v1 = vpop.f32.mrf.mxu1 }
  0xd9   :  { %645 = vst [vmem:[#allocation2 + $0x60] sm:$0xff] %v296_v62  ;;  %647 = vst [vmem:[#allocation2 + $0x70] sm:$0xff] %v489_v63  ;;  %v298_v2 = vadd.f32 %v297_v0, %v1054_v34  ;;  %v491_v3 = vadd.f32 %v490_v1, %v1056_v35 }
  0xda   :  { %v301_v4 = vpop.f32.mrf.mxu0  ;;  %v494_v5 = vpop.f32.mrf.mxu1 }
  0xdb   :  { %646 = vst [vmem:[#allocation2 + $0x68] sm:$0xff] %v298_v2  ;;  %648 = vst [vmem:[#allocation2 + $0x78] sm:$0xff] %v491_v3  ;;  %v302_v6 = vadd.f32 %v301_v4, %v1050_v32  ;;  %v495_v7 = vadd.f32 %v494_v5, %v1052_v33 }
  0xdc   :  { %v303_v8 = vpop.f32.mrf.mxu0  ;;  %v496_v9 = vpop.f32.mrf.mxu1 }
  0xdd   :  { %649 = vst [vmem:[#allocation2 + $0x80] sm:$0xff] %v302_v6  ;;  %651 = vst [vmem:[#allocation2 + $0x90] sm:$0xff] %v495_v7  ;;  %v304_v10 = vadd.f32 %v303_v8, %v1054_v34  ;;  %v497_v11 = vadd.f32 %v496_v9, %v1056_v35 }
  0xde   :  { %v305_v12 = vpop.f32.mrf.mxu0  ;;  %v498_v13 = vpop.f32.mrf.mxu1 }
  0xdf   :  { %650 = vst [vmem:[#allocation2 + $0x88] sm:$0xff] %v304_v10  ;;  %652 = vst [vmem:[#allocation2 + $0x98] sm:$0xff] %v497_v11  ;;  %v306_v14 = vadd.f32 %v305_v12, %v1050_v32  ;;  %v499_v15 = vadd.f32 %v498_v13, %v1052_v33 }
  0xe0   :  { %v307_v16 = vpop.f32.mrf.mxu0  ;;  %v500_v17 = vpop.f32.mrf.mxu1 }
  0xe1   :  { %653 = vst [vmem:[#allocation2 + $0xa0] sm:$0xff] %v306_v14  ;;  %655 = vst [vmem:[#allocation2 + $0xb0] sm:$0xff] %v499_v15  ;;  %v308_v18 = vadd.f32 %v307_v16, %v1054_v34  ;;  %v501_v19 = vadd.f32 %v500_v17, %v1056_v35 }
  0xe2   :  { %v311_v20 = vpop.f32.mrf.mxu0  ;;  %v504_v21 = vpop.f32.mrf.mxu1 }
  0xe3   :  { %654 = vst [vmem:[#allocation2 + $0xa8] sm:$0xff] %v308_v18  ;;  %656 = vst [vmem:[#allocation2 + $0xb8] sm:$0xff] %v501_v19  ;;  %v312_v22 = vadd.f32 %v311_v20, %v1050_v32  ;;  %v505_v23 = vadd.f32 %v504_v21, %v1052_v33 }
  0xe4   :  { %v313_v24 = vpop.f32.mrf.mxu0  ;;  %v506_v25 = vpop.f32.mrf.mxu1 }
  0xe5   :  { %657 = vst [vmem:[#allocation2 + $0xc0] sm:$0xff] %v312_v22  ;;  %659 = vst [vmem:[#allocation2 + $0xd0] sm:$0xff] %v505_v23  ;;  %v314_v26 = vadd.f32 %v313_v24, %v1054_v34  ;;  %v507_v27 = vadd.f32 %v506_v25, %v1056_v35 }
  0xe6   :  { %v315_v28 = vpop.f32.mrf.mxu0  ;;  %v508_v29 = vpop.f32.mrf.mxu1 }
  0xe7   :  { %658 = vst [vmem:[#allocation2 + $0xc8] sm:$0xff] %v314_v26  ;;  %660 = vst [vmem:[#allocation2 + $0xd8] sm:$0xff] %v507_v27  ;;  %v316_v30 = vadd.f32 %v315_v28, %v1050_v32  ;;  %v509_v31 = vadd.f32 %v508_v29, %v1052_v33 }
  0xe8   :  { %v317_v36 = vpop.f32.mrf.mxu0  ;;  %v510_v37 = vpop.f32.mrf.mxu1 }
  0xe9   :  { %661 = vst [vmem:[#allocation2 + $0xe0] sm:$0xff] %v316_v30  ;;  %663 = vst [vmem:[#allocation2 + $0xf0] sm:$0xff] %v509_v31  ;;  %v318_v38 = vadd.f32 %v317_v36, %v1054_v34  ;;  %v511_v39 = vadd.f32 %v510_v37, %v1056_v35 }
  0xea   :  { %v321_v40 = vpop.f32.mrf.mxu0  ;;  %v514_v41 = vpop.f32.mrf.mxu1 }
  0xeb   :  { %662 = vst [vmem:[#allocation2 + $0xe8] sm:$0xff] %v318_v38  ;;  %664 = vst [vmem:[#allocation2 + $0xf8] sm:$0xff] %v511_v39  ;;  %v322_v42 = vadd.f32 %v321_v40, %v1050_v32  ;;  %v515_v43 = vadd.f32 %v514_v41, %v1052_v33 }
  0xec   :  { %v323_v44 = vpop.f32.mrf.mxu0  ;;  %v516_v45 = vpop.f32.mrf.mxu1 }
  0xed   :  { %665 = vst [vmem:[#allocation2 + $0x100] sm:$0xff] %v322_v42  ;;  %667 = vst [vmem:[#allocation2 + $0x110] sm:$0xff] %v515_v43  ;;  %v324_v46 = vadd.f32 %v323_v44, %v1054_v34  ;;  %v517_v47 = vadd.f32 %v516_v45, %v1056_v35 }
  0xee   :  { %v325_v48 = vpop.f32.mrf.mxu0  ;;  %v518_v49 = vpop.f32.mrf.mxu1 }
  0xef   :  { %666 = vst [vmem:[#allocation2 + $0x108] sm:$0xff] %v324_v46  ;;  %668 = vst [vmem:[#allocation2 + $0x118] sm:$0xff] %v517_v47  ;;  %v326_v50 = vadd.f32 %v325_v48, %v1050_v32  ;;  %v519_v51 = vadd.f32 %v518_v49, %v1052_v33 }
  0xf0   :  { %v327_v52 = vpop.f32.mrf.mxu0  ;;  %v520_v53 = vpop.f32.mrf.mxu1 }
  0xf1   :  { %669 = vst [vmem:[#allocation2 + $0x120] sm:$0xff] %v326_v50  ;;  %671 = vst [vmem:[#allocation2 + $0x130] sm:$0xff] %v519_v51  ;;  %v328_v54 = vadd.f32 %v327_v52, %v1054_v34  ;;  %v521_v55 = vadd.f32 %v520_v53, %v1056_v35 }
  0xf2   :  { %v331_v56 = vpop.f32.mrf.mxu0  ;;  %v524_v57 = vpop.f32.mrf.mxu1 }
  0xf3   :  { %670 = vst [vmem:[#allocation2 + $0x128] sm:$0xff] %v328_v54  ;;  %672 = vst [vmem:[#allocation2 + $0x138] sm:$0xff] %v521_v55  ;;  %v332_v58 = vadd.f32 %v331_v56, %v1050_v32  ;;  %v525_v59 = vadd.f32 %v524_v57, %v1052_v33 }
  0xf4   :  { %v333_v60 = vpop.f32.mrf.mxu0  ;;  %v526_v61 = vpop.f32.mrf.mxu1 }
  0xf5   :  { %673 = vst [vmem:[#allocation2 + $0x140] sm:$0xff] %v332_v58  ;;  %675 = vst [vmem:[#allocation2 + $0x150] sm:$0xff] %v525_v59  ;;  %v334_v62 = vadd.f32 %v333_v60, %v1054_v34  ;;  %v527_v63 = vadd.f32 %v526_v61, %v1056_v35 }
  0xf6   :  { %v335_v0 = vpop.f32.mrf.mxu0  ;;  %v528_v1 = vpop.f32.mrf.mxu1 }
  0xf7   :  { %674 = vst [vmem:[#allocation2 + $0x148] sm:$0xff] %v334_v62  ;;  %676 = vst [vmem:[#allocation2 + $0x158] sm:$0xff] %v527_v63  ;;  %v336_v2 = vadd.f32 %v335_v0, %v1050_v32  ;;  %v529_v3 = vadd.f32 %v528_v1, %v1052_v33 }
  0xf8   :  { %v337_v4 = vpop.f32.mrf.mxu0  ;;  %v530_v5 = vpop.f32.mrf.mxu1 }
  0xf9   :  { %677 = vst [vmem:[#allocation2 + $0x160] sm:$0xff] %v336_v2  ;;  %679 = vst [vmem:[#allocation2 + $0x170] sm:$0xff] %v529_v3  ;;  %v338_v6 = vadd.f32 %v337_v4, %v1054_v34  ;;  %v531_v7 = vadd.f32 %v530_v5, %v1056_v35 }
  0xfa   :  { %v341_v8 = vpop.f32.mrf.mxu0  ;;  %v534_v9 = vpop.f32.mrf.mxu1 }
  0xfb   :  { %678 = vst [vmem:[#allocation2 + $0x168] sm:$0xff] %v338_v6  ;;  %680 = vst [vmem:[#allocation2 + $0x178] sm:$0xff] %v531_v7  ;;  %v342_v10 = vadd.f32 %v341_v8, %v1050_v32  ;;  %v535_v11 = vadd.f32 %v534_v9, %v1052_v33 }
  0xfc   :  { %v343_v12 = vpop.f32.mrf.mxu0  ;;  %v536_v13 = vpop.f32.mrf.mxu1 }
  0xfd   :  { %681 = vst [vmem:[#allocation2 + $0x180] sm:$0xff] %v342_v10  ;;  %683 = vst [vmem:[#allocation2 + $0x190] sm:$0xff] %v535_v11  ;;  %v344_v14 = vadd.f32 %v343_v12, %v1054_v34  ;;  %v537_v15 = vadd.f32 %v536_v13, %v1056_v35 }
  0xfe   :  { %v345_v16 = vpop.f32.mrf.mxu0  ;;  %v538_v17 = vpop.f32.mrf.mxu1 }
  0xff   :  { %682 = vst [vmem:[#allocation2 + $0x188] sm:$0xff] %v344_v14  ;;  %684 = vst [vmem:[#allocation2 + $0x198] sm:$0xff] %v537_v15  ;;  %v346_v18 = vadd.f32 %v345_v16, %v1050_v32  ;;  %v539_v19 = vadd.f32 %v538_v17, %v1052_v33 }
 0x100   :  { %v347_v20 = vpop.f32.mrf.mxu0  ;;  %v540_v21 = vpop.f32.mrf.mxu1 }
 0x101   :  { %685 = vst [vmem:[#allocation2 + $0x1a0] sm:$0xff] %v346_v18  ;;  %687 = vst [vmem:[#allocation2 + $0x1b0] sm:$0xff] %v539_v19  ;;  %v348_v22 = vadd.f32 %v347_v20, %v1054_v34  ;;  %v541_v23 = vadd.f32 %v540_v21, %v1056_v35 }
 0x102   :  { %v351_v24 = vpop.f32.mrf.mxu0  ;;  %v544_v25 = vpop.f32.mrf.mxu1 }
 0x103   :  { %686 = vst [vmem:[#allocation2 + $0x1a8] sm:$0xff] %v348_v22  ;;  %688 = vst [vmem:[#allocation2 + $0x1b8] sm:$0xff] %v541_v23  ;;  %v352_v26 = vadd.f32 %v351_v24, %v1050_v32  ;;  %v545_v27 = vadd.f32 %v544_v25, %v1052_v33 }
 0x104   :  { %v353_v28 = vpop.f32.mrf.mxu0  ;;  %v546_v29 = vpop.f32.mrf.mxu1 }
 0x105   :  { %689 = vst [vmem:[#allocation2 + $0x1c0] sm:$0xff] %v352_v26  ;;  %691 = vst [vmem:[#allocation2 + $0x1d0] sm:$0xff] %v545_v27  ;;  %v354_v30 = vadd.f32 %v353_v28, %v1054_v34  ;;  %v547_v31 = vadd.f32 %v546_v29, %v1056_v35 }
 0x106   :  { %v355_v36 = vpop.f32.mrf.mxu0  ;;  %v548_v37 = vpop.f32.mrf.mxu1 }
 0x107   :  { %690 = vst [vmem:[#allocation2 + $0x1c8] sm:$0xff] %v354_v30  ;;  %692 = vst [vmem:[#allocation2 + $0x1d8] sm:$0xff] %v547_v31  ;;  %v356_v38 = vadd.f32 %v355_v36, %v1050_v32  ;;  %v549_v39 = vadd.f32 %v548_v37, %v1052_v33 }
 0x108   :  { %v357_v40 = vpop.f32.mrf.mxu0  ;;  %v550_v41 = vpop.f32.mrf.mxu1 }
 0x109   :  { %693 = vst [vmem:[#allocation2 + $0x1e0] sm:$0xff] %v356_v38  ;;  %695 = vst [vmem:[#allocation2 + $0x1f0] sm:$0xff] %v549_v39  ;;  %v358_v42 = vadd.f32 %v357_v40, %v1054_v34  ;;  %v551_v43 = vadd.f32 %v550_v41, %v1056_v35 }
 0x10a   :  { %v361_v44 = vpop.f32.mrf.mxu0  ;;  %v554_v45 = vpop.f32.mrf.mxu1 }
 0x10b   :  { %694 = vst [vmem:[#allocation2 + $0x1e8] sm:$0xff] %v358_v42  ;;  %696 = vst [vmem:[#allocation2 + $0x1f8] sm:$0xff] %v551_v43  ;;  %v362_v46 = vadd.f32 %v361_v44, %v1050_v32  ;;  %v555_v47 = vadd.f32 %v554_v45, %v1052_v33 }
 0x10c   :  { %v363_v48 = vpop.f32.mrf.mxu0  ;;  %v556_v49 = vpop.f32.mrf.mxu1 }
 0x10d   :  { %697 = vst [vmem:[#allocation2 + $0x200] sm:$0xff] %v362_v46  ;;  %699 = vst [vmem:[#allocation2 + $0x210] sm:$0xff] %v555_v47  ;;  %v364_v50 = vadd.f32 %v363_v48, %v1054_v34  ;;  %v557_v51 = vadd.f32 %v556_v49, %v1056_v35 }
 0x10e   :  { %v365_v52 = vpop.f32.mrf.mxu0  ;;  %v558_v53 = vpop.f32.mrf.mxu1 }
 0x10f   :  { %698 = vst [vmem:[#allocation2 + $0x208] sm:$0xff] %v364_v50  ;;  %700 = vst [vmem:[#allocation2 + $0x218] sm:$0xff] %v557_v51  ;;  %v366_v54 = vadd.f32 %v365_v52, %v1050_v32  ;;  %v559_v55 = vadd.f32 %v558_v53, %v1052_v33 }
 0x110   :  { %v367_v56 = vpop.f32.mrf.mxu0  ;;  %v560_v57 = vpop.f32.mrf.mxu1 }
 0x111   :  { %701 = vst [vmem:[#allocation2 + $0x220] sm:$0xff] %v366_v54  ;;  %703 = vst [vmem:[#allocation2 + $0x230] sm:$0xff] %v559_v55  ;;  %v368_v58 = vadd.f32 %v367_v56, %v1054_v34  ;;  %v561_v59 = vadd.f32 %v560_v57, %v1056_v35 }
 0x112   :  { %v371_v60 = vpop.f32.mrf.mxu0  ;;  %v564_v61 = vpop.f32.mrf.mxu1 }
 0x113   :  { %702 = vst [vmem:[#allocation2 + $0x228] sm:$0xff] %v368_v58  ;;  %704 = vst [vmem:[#allocation2 + $0x238] sm:$0xff] %v561_v59  ;;  %v372_v62 = vadd.f32 %v371_v60, %v1050_v32  ;;  %v565_v63 = vadd.f32 %v564_v61, %v1052_v33 }
 0x114   :  { %v373_v0 = vpop.f32.mrf.mxu0  ;;  %v566_v1 = vpop.f32.mrf.mxu1 }
 0x115   :  { %705 = vst [vmem:[#allocation2 + $0x240] sm:$0xff] %v372_v62  ;;  %707 = vst [vmem:[#allocation2 + $0x250] sm:$0xff] %v565_v63  ;;  %v374_v2 = vadd.f32 %v373_v0, %v1054_v34  ;;  %v567_v3 = vadd.f32 %v566_v1, %v1056_v35 }
 0x116   :  { %v375_v4 = vpop.f32.mrf.mxu0  ;;  %v568_v5 = vpop.f32.mrf.mxu1 }
 0x117   :  { %706 = vst [vmem:[#allocation2 + $0x248] sm:$0xff] %v374_v2  ;;  %708 = vst [vmem:[#allocation2 + $0x258] sm:$0xff] %v567_v3  ;;  %v376_v6 = vadd.f32 %v375_v4, %v1050_v32  ;;  %v569_v7 = vadd.f32 %v568_v5, %v1052_v33 }
 0x118   :  { %v377_v8 = vpop.f32.mrf.mxu0  ;;  %v570_v9 = vpop.f32.mrf.mxu1 }
 0x119   :  { %709 = vst [vmem:[#allocation2 + $0x260] sm:$0xff] %v376_v6  ;;  %711 = vst [vmem:[#allocation2 + $0x270] sm:$0xff] %v569_v7  ;;  %v378_v10 = vadd.f32 %v377_v8, %v1054_v34  ;;  %v571_v11 = vadd.f32 %v570_v9, %v1056_v35 }
 0x11a   :  { %v381_v12 = vpop.f32.mrf.mxu0  ;;  %v574_v13 = vpop.f32.mrf.mxu1 }
 0x11b   :  { %710 = vst [vmem:[#allocation2 + $0x268] sm:$0xff] %v378_v10  ;;  %712 = vst [vmem:[#allocation2 + $0x278] sm:$0xff] %v571_v11  ;;  %v382_v14 = vadd.f32 %v381_v12, %v1050_v32  ;;  %v575_v15 = vadd.f32 %v574_v13, %v1052_v33 }
 0x11c   :  { %v383_v16 = vpop.f32.mrf.mxu0  ;;  %v576_v17 = vpop.f32.mrf.mxu1 }
 0x11d   :  { %713 = vst [vmem:[#allocation2 + $0x280] sm:$0xff] %v382_v14  ;;  %715 = vst [vmem:[#allocation2 + $0x290] sm:$0xff] %v575_v15  ;;  %v384_v18 = vadd.f32 %v383_v16, %v1054_v34  ;;  %v577_v19 = vadd.f32 %v576_v17, %v1056_v35 }
 0x11e   :  { %v385_v20 = vpop.f32.mrf.mxu0  ;;  %v578_v21 = vpop.f32.mrf.mxu1 }
 0x11f   :  { %714 = vst [vmem:[#allocation2 + $0x288] sm:$0xff] %v384_v18  ;;  %716 = vst [vmem:[#allocation2 + $0x298] sm:$0xff] %v577_v19  ;;  %v386_v22 = vadd.f32 %v385_v20, %v1050_v32  ;;  %v579_v23 = vadd.f32 %v578_v21, %v1052_v33 }
 0x120   :  { %v387_v24 = vpop.f32.mrf.mxu0  ;;  %v580_v25 = vpop.f32.mrf.mxu1 }
 0x121   :  { %717 = vst [vmem:[#allocation2 + $0x2a0] sm:$0xff] %v386_v22  ;;  %719 = vst [vmem:[#allocation2 + $0x2b0] sm:$0xff] %v579_v23  ;;  %v388_v26 = vadd.f32 %v387_v24, %v1054_v34  ;;  %v581_v27 = vadd.f32 %v580_v25, %v1056_v35 }
 0x122   :  { %v391_v28 = vpop.f32.mrf.mxu0  ;;  %v584_v29 = vpop.f32.mrf.mxu1 }
 0x123   :  { %718 = vst [vmem:[#allocation2 + $0x2a8] sm:$0xff] %v388_v26  ;;  %720 = vst [vmem:[#allocation2 + $0x2b8] sm:$0xff] %v581_v27  ;;  %v392_v30 = vadd.f32 %v391_v28, %v1050_v32  ;;  %v585_v31 = vadd.f32 %v584_v29, %v1052_v33 }
 0x124   :  { %v393_v36 = vpop.f32.mrf.mxu0  ;;  %v586_v37 = vpop.f32.mrf.mxu1 }
 0x125   :  { %721 = vst [vmem:[#allocation2 + $0x2c0] sm:$0xff] %v392_v30  ;;  %723 = vst [vmem:[#allocation2 + $0x2d0] sm:$0xff] %v585_v31  ;;  %v394_v38 = vadd.f32 %v393_v36, %v1054_v34  ;;  %v587_v39 = vadd.f32 %v586_v37, %v1056_v35 }
 0x126   :  { %v395_v40 = vpop.f32.mrf.mxu0  ;;  %v588_v41 = vpop.f32.mrf.mxu1 }
 0x127   :  { %722 = vst [vmem:[#allocation2 + $0x2c8] sm:$0xff] %v394_v38  ;;  %724 = vst [vmem:[#allocation2 + $0x2d8] sm:$0xff] %v587_v39  ;;  %v396_v42 = vadd.f32 %v395_v40, %v1050_v32  ;;  %v589_v43 = vadd.f32 %v588_v41, %v1052_v33 }
 0x128   :  { %v397_v44 = vpop.f32.mrf.mxu0  ;;  %v590_v45 = vpop.f32.mrf.mxu1 }
 0x129   :  { %725 = vst [vmem:[#allocation2 + $0x2e0] sm:$0xff] %v396_v42  ;;  %727 = vst [vmem:[#allocation2 + $0x2f0] sm:$0xff] %v589_v43  ;;  %v398_v46 = vadd.f32 %v397_v44, %v1054_v34  ;;  %v591_v47 = vadd.f32 %v590_v45, %v1056_v35 }
 0x12a   :  { %v401_v48 = vpop.f32.mrf.mxu0  ;;  %v594_v49 = vpop.f32.mrf.mxu1 }
 0x12b   :  { %726 = vst [vmem:[#allocation2 + $0x2e8] sm:$0xff] %v398_v46  ;;  %728 = vst [vmem:[#allocation2 + $0x2f8] sm:$0xff] %v591_v47  ;;  %v402_v50 = vadd.f32 %v401_v48, %v1050_v32  ;;  %v595_v51 = vadd.f32 %v594_v49, %v1052_v33 }
 0x12c   :  { %v403_v52 = vpop.f32.mrf.mxu0  ;;  %v596_v53 = vpop.f32.mrf.mxu1 }
 0x12d   :  { %729 = vst [vmem:[#allocation2 + $0x300] sm:$0xff] %v402_v50  ;;  %731 = vst [vmem:[#allocation2 + $0x310] sm:$0xff] %v595_v51  ;;  %v404_v54 = vadd.f32 %v403_v52, %v1054_v34  ;;  %v597_v55 = vadd.f32 %v596_v53, %v1056_v35 }
 0x12e   :  { %v405_v56 = vpop.f32.mrf.mxu0  ;;  %v598_v57 = vpop.f32.mrf.mxu1 }
 0x12f   :  { %730 = vst [vmem:[#allocation2 + $0x308] sm:$0xff] %v404_v54  ;;  %732 = vst [vmem:[#allocation2 + $0x318] sm:$0xff] %v597_v55  ;;  %v406_v58 = vadd.f32 %v405_v56, %v1050_v32  ;;  %v599_v59 = vadd.f32 %v598_v57, %v1052_v33 }
 0x130   :  { %v407_v60 = vpop.f32.mrf.mxu0  ;;  %v600_v61 = vpop.f32.mrf.mxu1 }
 0x131   :  { %733 = vst [vmem:[#allocation2 + $0x320] sm:$0xff] %v406_v58  ;;  %735 = vst [vmem:[#allocation2 + $0x330] sm:$0xff] %v599_v59  ;;  %v408_v62 = vadd.f32 %v407_v60, %v1054_v34  ;;  %v601_v63 = vadd.f32 %v600_v61, %v1056_v35 }
 0x132   :  { %v411_v0 = vpop.f32.mrf.mxu0  ;;  %v604_v1 = vpop.f32.mrf.mxu1 }
 0x133   :  { %734 = vst [vmem:[#allocation2 + $0x328] sm:$0xff] %v408_v62  ;;  %736 = vst [vmem:[#allocation2 + $0x338] sm:$0xff] %v601_v63  ;;  %v412_v2 = vadd.f32 %v411_v0, %v1050_v32  ;;  %v605_v3 = vadd.f32 %v604_v1, %v1052_v33 }
 0x134   :  { %v413_v4 = vpop.f32.mrf.mxu0  ;;  %v606_v5 = vpop.f32.mrf.mxu1 }
 0x135   :  { %737 = vst [vmem:[#allocation2 + $0x340] sm:$0xff] %v412_v2  ;;  %739 = vst [vmem:[#allocation2 + $0x350] sm:$0xff] %v605_v3  ;;  %v414_v6 = vadd.f32 %v413_v4, %v1054_v34  ;;  %v607_v7 = vadd.f32 %v606_v5, %v1056_v35 }
 0x136   :  { %v415_v8 = vpop.f32.mrf.mxu0  ;;  %v608_v9 = vpop.f32.mrf.mxu1 }
 0x137   :  { %738 = vst [vmem:[#allocation2 + $0x348] sm:$0xff] %v414_v6  ;;  %740 = vst [vmem:[#allocation2 + $0x358] sm:$0xff] %v607_v7  ;;  %v416_v10 = vadd.f32 %v415_v8, %v1050_v32  ;;  %v609_v11 = vadd.f32 %v608_v9, %v1052_v33 }
 0x138   :  { %v417_v12 = vpop.f32.mrf.mxu0  ;;  %v610_v13 = vpop.f32.mrf.mxu1 }
 0x139   :  { %741 = vst [vmem:[#allocation2 + $0x360] sm:$0xff] %v416_v10  ;;  %743 = vst [vmem:[#allocation2 + $0x370] sm:$0xff] %v609_v11  ;;  %v418_v14 = vadd.f32 %v417_v12, %v1054_v34  ;;  %v611_v15 = vadd.f32 %v610_v13, %v1056_v35 }
 0x13a   :  { %v421_v16 = vpop.f32.mrf.mxu0  ;;  %v614_v17 = vpop.f32.mrf.mxu1 }
 0x13b   :  { %742 = vst [vmem:[#allocation2 + $0x368] sm:$0xff] %v418_v14  ;;  %744 = vst [vmem:[#allocation2 + $0x378] sm:$0xff] %v611_v15  ;;  %v422_v18 = vadd.f32 %v421_v16, %v1050_v32  ;;  %v615_v19 = vadd.f32 %v614_v17, %v1052_v33 }
 0x13c   :  { %v423_v20 = vpop.f32.mrf.mxu0  ;;  %v616_v21 = vpop.f32.mrf.mxu1 }
 0x13d   :  { %745 = vst [vmem:[#allocation2 + $0x380] sm:$0xff] %v422_v18  ;;  %747 = vst [vmem:[#allocation2 + $0x390] sm:$0xff] %v615_v19  ;;  %v424_v22 = vadd.f32 %v423_v20, %v1054_v34  ;;  %v617_v23 = vadd.f32 %v616_v21, %v1056_v35 }
 0x13e   :  { %v425_v24 = vpop.f32.mrf.mxu0  ;;  %v618_v25 = vpop.f32.mrf.mxu1 }
 0x13f   :  { %746 = vst [vmem:[#allocation2 + $0x388] sm:$0xff] %v424_v22  ;;  %748 = vst [vmem:[#allocation2 + $0x398] sm:$0xff] %v617_v23  ;;  %v426_v26 = vadd.f32 %v425_v24, %v1050_v32  ;;  %v619_v27 = vadd.f32 %v618_v25, %v1052_v33 }
 0x140   :  { %v427_v28 = vpop.f32.mrf.mxu0  ;;  %v620_v29 = vpop.f32.mrf.mxu1 }
 0x141   :  { %749 = vst [vmem:[#allocation2 + $0x3a0] sm:$0xff] %v426_v26  ;;  %751 = vst [vmem:[#allocation2 + $0x3b0] sm:$0xff] %v619_v27  ;;  %v428_v30 = vadd.f32 %v427_v28, %v1054_v34  ;;  %v621_v31 = vadd.f32 %v620_v29, %v1056_v35 }
 0x142   :  { %v431_v36 = vpop.f32.mrf.mxu0  ;;  %v624_v37 = vpop.f32.mrf.mxu1 }
 0x143   :  { %750 = vst [vmem:[#allocation2 + $0x3a8] sm:$0xff] %v428_v30  ;;  %752 = vst [vmem:[#allocation2 + $0x3b8] sm:$0xff] %v621_v31  ;;  %v432_v38 = vadd.f32 %v431_v36, %v1050_v32  ;;  %v625_v39 = vadd.f32 %v624_v37, %v1052_v33 }
 0x144   :  { %v433_v40 = vpop.f32.mrf.mxu0  ;;  %v626_v41 = vpop.f32.mrf.mxu1 }
 0x145   :  { %753 = vst [vmem:[#allocation2 + $0x3c0] sm:$0xff] %v432_v38  ;;  %755 = vst [vmem:[#allocation2 + $0x3d0] sm:$0xff] %v625_v39  ;;  %v434_v42 = vadd.f32 %v433_v40, %v1054_v34  ;;  %v627_v43 = vadd.f32 %v626_v41, %v1056_v35 }
 0x146   :  { %v435_v44 = vpop.f32.mrf.mxu0  ;;  %v628_v45 = vpop.f32.mrf.mxu1 }
 0x147   :  { %754 = vst [vmem:[#allocation2 + $0x3c8] sm:$0xff] %v434_v42  ;;  %756 = vst [vmem:[#allocation2 + $0x3d8] sm:$0xff] %v627_v43  ;;  %v436_v46 = vadd.f32 %v435_v44, %v1050_v32  ;;  %v629_v47 = vadd.f32 %v628_v45, %v1052_v33 }
 0x148   :  { %v437_v48 = vpop.f32.mrf.mxu0  ;;  %v630_v49 = vpop.f32.mrf.mxu1 }
 0x149   :  { %757 = vst [vmem:[#allocation2 + $0x3e0] sm:$0xff] %v436_v46  ;;  %759 = vst [vmem:[#allocation2 + $0x3f0] sm:$0xff] %v629_v47  ;;  %v438_v50 = vadd.f32 %v437_v48, %v1054_v34  ;;  %v631_v51 = vadd.f32 %v630_v49, %v1056_v35 }
 0x14b   :  { %758 = vst [vmem:[#allocation2 + $0x3e8] sm:$0xff] %v438_v50  ;;  %760 = vst [vmem:[#allocation2 + $0x3f8] sm:$0xff] %v631_v51 }
 0x14c   :  { %876 = shalt.err (!%p873_p4)
}
 0x14d   :  { %s889_s7 = smov 512   ;;  %s890_s8 = smov 32  }
 0x14e   :  { %772 = dma.vmem_to_hbm [thread:$0]  %s767_s2, 16384, %s1192_s3, [#allocation3], %s889_s7, %s889_s7, %s890_s8  }
 0x14f   :  { %885 = dma.done.wait [#allocation3], 16384  }
 0x150   :  { %886 = vsyncadd [#allocation3], 4294950912 }
 0x151   :  { %776 = vsyncpa [#allocation3], 1 }

</bundles_post_ra>
